<compile_context>
chip_gen: v6e
topology: v6e:2x2x1
jax: 0.10.0
libtpu: 0.0.40
codegen_flags: <defaults>
</compile_context>

<pallas_src>
import functools

import jax
import jax.numpy as jnp
from jax import lax
from jax.experimental import pallas as pl
from jax.experimental.pallas import tpu as pltpu


# ----------------------------------------------------------------------------
# generation-aware VMEM budget & tiling helpers
# ----------------------------------------------------------------------------
@functools.lru_cache(maxsize=None)
def _vmem_limit_bytes():
    """Scoped-VMEM limit: ~3/4 of physical VMEM (96 MiB v5e/v6e, 48 MiB v7x)."""
    cap = 64 * 1024 * 1024                      # conservative fallback (v7x per-core)
    try:
        cap = int(getattr(pltpu.get_tpu_info(), "vmem_capacity_bytes", cap))
    except Exception:
        pass
    limit = min(cap * 3 // 4, cap - 16 * 1024 * 1024)
    return max(32 * 1024 * 1024, limit)


def _lane_pad(c):
    return ((c + 127) // 128) * 128


def _rows_per_tile(n_rows, row_bytes_padded, target_bytes, *, min_grid=4):
    """Rows per block, sized from the lane-padded VMEM footprint.

    Multiple of 8 (or == n_rows for a single full block), capped so a few grid
    steps remain for pipelining / megacore sharding.
    """
    rows = max(8, (target_bytes // max(row_bytes_padded, 1)) // 8 * 8)
    cap = max(8, ((pl.cdiv(n_rows, min_grid) + 7) // 8) * 8)
    rows = min(rows, cap)
    if rows >= n_rows:
        return n_rows
    return rows


# ----------------------------------------------------------------------------
# kernel: per-sample L2 normalization  (d / (||d||_2 + 1e-8), per row)
# ----------------------------------------------------------------------------
def _l2_normalize_kernel(d_ref, out_ref):
    d = d_ref[...].astype(jnp.float32)                       # (tile_n, F)
    ss = jnp.sum(d * d, axis=1, keepdims=True)               # (tile_n, 1)
    # EUP rsqrt; differs from 1/(||d||+1e-8) by ~1e-8 relative (<< 1e-4 tol),
    # and the clamp keeps an all-zero row at exactly 0 like the reference.
    inv = lax.rsqrt(jnp.maximum(ss, 1e-16))
    out_ref[...] = (d * inv).astype(out_ref.dtype)


def l2_normalize(d):
    n = d.shape[0]
    flat = d.reshape(n, -1).astype(jnp.float32)
    f = flat.shape[1]
    vmem_limit = _vmem_limit_bytes()
    # in + out, double-buffered -> 4 live buffers -> ~limit/8 per buffer
    tile_n = _rows_per_tile(n, _lane_pad(f) * 4, vmem_limit // 8)
    grid = (pl.cdiv(n, tile_n),)
    out = pl.pallas_call(
        _l2_normalize_kernel,
        out_shape=jax.ShapeDtypeStruct((n, f), jnp.float32),
        grid=grid,
        in_specs=[pl.BlockSpec((tile_n, f), lambda i: (i, 0))],
        out_specs=pl.BlockSpec((tile_n, f), lambda i: (i, 0)),
        compiler_params=pltpu.CompilerParams(
            dimension_semantics=("parallel",),
            vmem_limit_bytes=vmem_limit,
        ),
    )(flat)
    return out.reshape(d.shape)


# ----------------------------------------------------------------------------
# fused kernel:  sum_n KL(softmax(clean_n) || softmax(hat_n))   and
#                sum_n logsumexp(clean_n)
# clean-logits statistics (max / exp / denom / log) are computed once and
# shared by both quantities; the class dim is padded to 128 lanes with -1e30.
# ----------------------------------------------------------------------------
def _kl_ce_fused_kernel(clean_ref, hat_ref, out_ref, acc_kl_ref, acc_lse_ref,
                        *, n_rows, tile_n, blocks_per_split):
    s = pl.program_id(0)          # batch split (sharded across TCs on v7x)
    i = pl.program_id(1)          # reduction over row-blocks within the split

    @pl.when(i == 0)
    def _():
        acc_kl_ref[...] = jnp.zeros_like(acc_kl_ref)
        acc_lse_ref[...] = jnp.zeros_like(acc_lse_ref)

    clean = clean_ref[...].astype(jnp.float32)               # (tile_n, Cp)
    hat = hat_ref[...].astype(jnp.float32)

    # shared clean statistics: one exp pass, one log + one recip per row
    m_c = jnp.max(clean, axis=1, keepdims=True)
    e_c = jnp.exp(clean - m_c)
    denom_c = jnp.sum(e_c, axis=1, keepdims=True)
    log_den_c = jnp.log(denom_c)
    p = e_c * (1.0 / denom_c)                                # softmax(clean)
    logp = (clean - m_c) - log_den_c                         # log_softmax(clean)
    lse = m_c + log_den_c                                    # logsumexp(clean) -> CE

    # perturbed logits: only log_softmax needed
    m_h = jnp.max(hat, axis=1, keepdims=True)
    log_den_h = jnp.log(jnp.sum(jnp.exp(hat - m_h), axis=1, keepdims=True))
    logq = (hat - m_h) - log_den_h

    kl_row = jnp.sum(p * (logp - logq), axis=1, keepdims=True)   # (tile_n, 1)

    # mask rows beyond the real batch (zero-padded rows give exactly-0 KL, but
    # their lse is log(Cp); padded -1e30 class columns contribute exactly 0).
    start = (s * blocks_per_split + i) * tile_n
    row = lax.broadcasted_iota(jnp.int32, (tile_n, 1), 0)
    valid = row < (n_rows - start)
    acc_kl_ref[...] += jnp.sum(jnp.where(valid, kl_row, 0.0), axis=0, keepdims=True)
    acc_lse_ref[...] += jnp.sum(jnp.where(valid, lse, 0.0), axis=0, keepdims=True)

    @pl.when(i == pl.num_programs(1) - 1)
    def _():
        # lane-dense (1,128) partial-sum block for this split: lane0=KL, lane1=lse
        col = lax.broadcasted_iota(jnp.int32, (1, 128), 1)
        out_ref[...] = (jnp.where(col == 0, acc_kl_ref[...], 0.0)
                        + jnp.where(col == 1, acc_lse_ref[...], 0.0))


def kl_and_lse_sums(clean_logits, hat_logits):
    """Returns (sum_n KL(softmax(clean_n)||softmax(hat_n)), sum_n logsumexp(clean_n))."""
    n, c = clean_logits.shape
    cp = _lane_pad(c)
    vmem_limit = _vmem_limit_bytes()

    # lane-dense class dim: pad to a multiple of 128 with -1e30 (exp() == 0)
    clean_p = jnp.pad(clean_logits.astype(jnp.float32), ((0, 0), (0, cp - c)),
                      constant_values=-1e30)
    hat_p = jnp.pad(hat_logits.astype(jnp.float32), ((0, 0), (0, cp - c)),
                    constant_values=-1e30)

    # 2 inputs, double-buffered -> 4 live buffers -> ~limit/8 per buffer
    tile_n = _rows_per_tile(n, cp * 4, vmem_limit // 8)
    n_blocks = pl.cdiv(n, tile_n)
    num_splits = 2 if n_blocks >= 2 else 1       # v7x: use both TensorCores
    bps = pl.cdiv(n_blocks, num_splits)
    n_pad = num_splits * bps * tile_n
    if n_pad > n:                                # zero row padding (exact-0 KL rows)
        clean_p = jnp.pad(clean_p, ((0, n_pad - n), (0, 0)))
        hat_p = jnp.pad(hat_p, ((0, n_pad - n), (0, 0)))

    kernel = functools.partial(_kl_ce_fused_kernel, n_rows=n, tile_n=tile_n,
                               blocks_per_split=bps)
    out = pl.pallas_call(
        kernel,
        out_shape=jax.ShapeDtypeStruct((1, num_splits * 128), jnp.float32),
        grid=(num_splits, bps),
        in_specs=[
            pl.BlockSpec((tile_n, cp), lambda s, i: (s * bps + i, 0)),
            pl.BlockSpec((tile_n, cp), lambda s, i: (s * bps + i, 0)),
        ],
        out_specs=pl.BlockSpec((1, 128), lambda s, i: (0, s)),
        scratch_shapes=[pltpu.VMEM((1, 1), jnp.float32),
                        pltpu.VMEM((1, 1), jnp.float32)],
        compiler_params=pltpu.CompilerParams(
            dimension_semantics=("parallel", "arbitrary"),
            vmem_limit_bytes=vmem_limit,
        ),
    )(clean_p, hat_p)
    parts = out.reshape(num_splits, 128)
    return jnp.sum(parts[:, 0]), jnp.sum(parts[:, 1])


# ----------------------------------------------------------------------------
# stand-in model + VATLoss forward
# ----------------------------------------------------------------------------
# TODO(synk): VATLoss takes an arbitrary nn.Module; a simple linear classifier
# stands in here so the full forward (including the adversarial power
# iteration) is runnable end-to-end.  adv_distance.backward() differentiates
# through the model, so that step uses plain jax.grad (no Pallas equivalent for
# autograd through an arbitrary network), and _disable_tracking_bn_stats has no
# JAX counterpart (no BN running stats in the stand-in model).
def model_apply(params, x):
    w, b = params
    n = x.shape[0]
    return x.reshape(n, -1).astype(jnp.float32) @ w + b


def vat_loss_forward(params, x, labels, key, *, xi=10.0, eps=8.0, ip=1, alpha=1.0):
    n = x.shape[0]
    logits_clean = model_apply(params, x)
    pred = jax.lax.stop_gradient(jax.nn.softmax(logits_clean, axis=1))

    d = jax.random.uniform(key, x.shape, dtype=jnp.float32) - 0.5
    d = l2_normalize(d)                                        # Pallas

    def _adv_kl(dd):
        logits_hat = model_apply(params, x + xi * dd)
        logp_hat = jax.nn.log_softmax(logits_hat, axis=1)
        logp = jnp.where(pred > 0, jnp.log(pred), 0.0)
        return jnp.sum(pred * (logp - logp_hat)) / n

    for _ in range(ip):
        g = jax.grad(_adv_kl)(d)
        d = l2_normalize(g)                                    # Pallas

    logits_hat = model_apply(params, x + d * eps)

    kl_sum, lse_sum = kl_and_lse_sums(logits_clean, logits_hat)  # fused Pallas
    lds = kl_sum / n                                             # batchmean KL
    # cross_entropy = mean(lse - logit[label]); the label gather is a tiny XLA
    # gather of n scalars in the wrapper (no lane-sparse labels block in VMEM).
    x_y = jnp.take_along_axis(logits_clean, labels.astype(jnp.int32)[:, None], axis=1)
    cls = lse_sum / n - jnp.mean(x_y)
    return cls + alpha * lds


# ----------------------------------------------------------------------------
# plain-JAX reference (mirrors the PyTorch module)
# ----------------------------------------------------------------------------
def _l2_normalize_ref(d):
    n = d.shape[0]
    flat = d.reshape(n, -1)
    norm = jnp.sqrt(jnp.sum(flat * flat, axis=1, keepdims=True))
    return (flat / (norm + 1e-8)).reshape(d.shape)


def vat_loss_ref(params, x, labels, key, *, xi=10.0, eps=8.0, ip=1, alpha=1.0):
    n = x.shape[0]
    logits_clean = model_apply(params, x)
    pred = jax.lax.stop_gradient(jax.nn.softmax(logits_clean, axis=1))

    d = jax.random.uniform(key, x.shape, dtype=jnp.float32) - 0.5
    d = _l2_normalize_ref(d)

    def _adv_kl(dd):
        logits_hat = model_apply(params, x + xi * dd)
        logp_hat = jax.nn.log_softmax(logits_hat, axis=1)
        logp = jnp.where(pred > 0, jnp.log(pred), 0.0)
        return jnp.sum(pred * (logp - logp_hat)) / n

    for _ in range(ip):
        g = jax.grad(_adv_kl)(d)
        d = _l2_normalize_ref(g)

    logits_hat = model_apply(params, x + d * eps)
    logq = jax.nn.log_softmax(logits_hat, axis=1)
    logp = jnp.log(pred)
    lds = jnp.sum(pred * (logp - logq)) / n

    logp_clean = jax.nn.log_softmax(logits_clean, axis=1)
    cls = -jnp.mean(jnp.take_along_axis(logp_clean, labels[:, None], axis=1))
    return cls + alpha * lds


# ----------------------------------------------------------------------------
if __name__ == "__main__":
    batch, channels, spatial, num_classes = 4, 3, 8, 10
    xi, eps, ip, alpha = 10.0, 8.0, 1, 1.0

    key = jax.random.PRNGKey(0)
    k_x, k_lab, k_w, k_d = jax.random.split(key, 4)

    x = jax.random.normal(k_x, (batch, channels, spatial, spatial), dtype=jnp.float32)
    labels = jax.random.randint(k_lab, (batch,), 0, num_classes, dtype=jnp.int32)

    feat = channels * spatial * spatial
    w = 0.1 * jax.random.normal(k_w, (feat, num_classes), dtype=jnp.float32)
    b = jnp.zeros((num_classes,), dtype=jnp.float32)
    params = (w, b)

    loss = vat_loss_forward(params, x, labels, k_d,
                            xi=xi, eps=eps, ip=ip, alpha=alpha)
    loss = jax.block_until_ready(loss)

    ref = vat_loss_ref(params, x, labels, k_d,
                       xi=xi, eps=eps, ip=ip, alpha=alpha)
    ref = jax.block_until_ready(ref)

    assert jnp.isfinite(loss), loss
    assert jnp.allclose(loss, ref, rtol=1e-4, atol=1e-4), (loss, ref)

    print("KERNEL_OK")
</pallas_src>

<mosaic_0001>
module attributes {stable_mosaic.version = 11 : i64} {
  func.func @_l2_normalize_kernel(%arg0: i32, %arg1: memref<4x192xf32, #tpu.memory_space<vmem>>, %arg2: memref<4x192xf32, #tpu.memory_space<vmem>>) attributes {dimension_semantics = [#tpu.dimension_semantics<parallel>], iteration_bounds = array<i64: 1>, scalar_prefetch = 0 : i64, scratch_operands = 0 : i64, tpu.core_type = #tpu.core_type<tc>, window_params = [{transform_indices = @transform_0, window_bounds = array<i64: 4, 192>}, {transform_indices = @transform_1, window_bounds = array<i64: 4, 192>}]} {
    %c0 = arith.constant 0 : index
    %c0_0 = arith.constant 0 : index
    %0 = vector.load %arg1[%c0, %c0_0] : memref<4x192xf32, #tpu.memory_space<vmem>>, vector<4x192xf32>
    %1 = arith.mulf %0, %0 : vector<4x192xf32>
    %cst = arith.constant dense<0.000000e+00> : vector<4xf32>
    %2 = vector.multi_reduction <add>, %1, %cst [1] : vector<4x192xf32> to vector<4xf32>
    %3 = vector.shape_cast %2 : vector<4xf32> to vector<4x1xf32>
    %cst_1 = arith.constant 1.000000e-16 : f32
    %4 = vector.broadcast %cst_1 : f32 to vector<4x1xf32>
    %5 = arith.maximumf %3, %4 : vector<4x1xf32>
    %6 = math.rsqrt %5 : vector<4x1xf32>
    %7 = vector.broadcast %6 : vector<4x1xf32> to vector<4x192xf32>
    %8 = arith.mulf %0, %7 : vector<4x192xf32>
    %c0_2 = arith.constant 0 : index
    %c0_3 = arith.constant 0 : index
    %9 = vector.load %arg2[%c0_2, %c0_3] : memref<4x192xf32, #tpu.memory_space<vmem>>, vector<4x192xf32>
    tpu.vector_store %arg2[%c0_2, %c0_3], %8 {strides = array<i32>} : memref<4x192xf32, #tpu.memory_space<vmem>>, vector<4x192xf32>,
    return
  }
  func.func @transform_0(%arg0: i32) -> (i32, i32) {
    %c0_i32 = arith.constant 0 : i32
    %c0_i32_0 = arith.constant 0 : i32
    return %arg0, %c0_i32 : i32, i32
  }
  func.func @transform_1(%arg0: i32) -> (i32, i32) {
    %c0_i32 = arith.constant 0 : i32
    %c0_i32_0 = arith.constant 0 : i32
    return %arg0, %c0_i32 : i32, i32
  }
}

</mosaic_0001>

<bundles_post_ra>
// kernel: tpu_custom_call.1
= control target key start
LH: loop header
LB: loop body
LE: loop exit
PB: predicated region body
PF: predicated region fallthrough
CT: control target
= control target key end

     0   :  { %6 = vsyncpa [#allocation3], 0  ;;  %s133_s0 = inlined_call_operand.hbm [shape: f32[4,192], index: 0, kind: input, shape index: {}]   ;;  %s134_s1 = inlined_call_operand.hbm [shape: f32[4,192], index: 1, kind: output, shape index: {}]  }
   0x1   :  { %7 = vsyncpa [#allocation4], 0  ;;  %s112_s6 = smov [#allocation2]  }
   0x2   :  { %s14_s7 = sshll.u32 %s112_s6, 4  ;;  %s15_s7 = int_to_ptr.vmem [resolvable:$true] %s14_s7 }
   0x3   :  { %s76_s8 = scalar_lea.vmem %s15_s7, 128  ;;  %p81_p1 = scmp.lt.s32.totalorder %s15_s7, %s15_s7 }
   0x4   :  { %p77_p0 = scmp.ne.s32.totalorder %s15_s7, %s76_s8  ;;  %p82_p2 = scmp.lt.s32.totalorder %s76_s8, %s76_s8 }
   0x6   :  { %p83_p3 = por %p82_p2, %p81_p1 }
   0x8   :  { %p84_p4 = pnand %p83_p3, %p77_p0 }
   0xa   :  { %87 = shalt.err (!%p84_p4)
}
   0xb   :  { %17 = dma.hbm_to_vmem [thread:$0]  %s133_s0, 128, %s15_s7, [#allocation3]  }
   0xc   :  { %108 = dma.done.wait [#allocation3], 128  }
   0xd   :  { %109 = vsyncadd [#allocation3], 4294967168  ;;  %v21_v0 = vld [vmem:[#allocation2] sm:$0xff]  ;;  %vm26_vm0 = vcmask 1043456   ;;  %vm28_vm1 = vcmask 519168   ;;  %v39_v10 = vlaneseq  ;;  %vm45_vm2 = vcmask 523268  }
   0xe   :  { %v22_v1 = vmul.f32 %v21_v0, %v21_v0  ;;  %v113_v8 = vmov 839922192   ;;  %s114_s0 = smov [#allocation5]   ;;  %vm46_vm3 = vmor %vm45_vm2, %vm26_vm0 }
   0xf   :  { %v37_v9 = vunpack.c.l.s4 %v113_v8  ;;  %v40_v12 = vshrl.u32 %v39_v10, 7  ;;  %s54_s11 = sshll.u32 %s114_s0, 4  ;;  %s55_s11 = int_to_ptr.vmem [resolvable:$true] %s54_s11 }
  0x10   :  { %v24_v2 = vcombine.high %v22_v1, %v22_v1  ;;  %v27_v3 = vsel %vm26_vm0, %v22_v1, 0.0  ;;  %s88_s12 = scalar_lea.vmem %s55_s11, 128  ;;  %p93_p6 = scmp.lt.s32.totalorder %s55_s11, %s55_s11 }
  0x11   :  { %v38_v11 = vunpack.c.0.s8 %v37_v9  ;;  %p89_p5 = scmp.ne.s32.totalorder %s55_s11, %s88_s12  ;;  %p94_p7 = scmp.lt.s32.totalorder %s88_s12, %s88_s12 }
  0x12   :  { %v29_v4 = vsel %vm28_vm1, %v24_v2, 0.0 }
  0x13   :  { %v30_v5 = vadd.f32 %v29_v4, %v27_v3  ;;  %v41_v13 = vsub.s32 %v38_v11, %v40_v12  ;;  %p95_p8 = por %p94_p7, %p93_p6 }
  0x15   :  { %31 = vadd.xlane.f32.xlu0 %v30_v5  ;;  %p96_p9 = pnand %p95_p8, %p89_p5 }
  0x9e   :  { %v32_v6 = vpop.xlane.xlu0 %31 }
  0x9f   :  { %v33_v7 = vmax.f32 %v32_v6, 1e-16 }
  0xa1   :  { %66 = vrsqrt.f32 %v33_v7 }
  0xae   :  { %v67_v14 = vpop.eup %66 }
  0xaf   :  { %v42_v15 = vrot.slane %v67_v14, %v41_v13 }
  0xb1   :  { %v44_v16 = vmul.f32 %v42_v15, %v21_v0 }
  0xb3   :  { %47 = vst.msk [vmem:[#allocation5] sm:$0xff] %vm46_vm3, %v44_v16 }
  0xb4   :  { %99 = shalt.err (!%p96_p9)
}
  0xb5   :  { %57 = dma.vmem_to_hbm [thread:$0]  %s55_s11, 128, %s134_s1, [#allocation4]  }
  0xb6   :  { %110 = dma.done.wait [#allocation4], 128  }
  0xb7   :  { %111 = vsyncadd [#allocation4], 4294967168 }
  0xb8   :  { %61 = vsyncpa [#allocation3], 1 }
  0xb9   :  { %62 = vsyncpa [#allocation4], 1 }

</bundles_post_ra>
